<compile_context>
chip_gen: v7x
topology: tpu7x:2x2x1
jax: 0.10.0
libtpu: 0.0.40
codegen_flags: <defaults>
</compile_context>

<pallas_src>
import functools

import jax
import jax.numpy as jnp
from jax.experimental import pallas as pl
from jax.experimental.pallas import tpu as pltpu


# ----------------------------- Pallas kernel --------------------------------
def _se_block_kernel(
    x_ref,        # (1, Cin, HW)        f32   input image (NCHW, HW flattened)
    mask_ref,     # (9, 1, HW)          f32   {0,1} border masks per 3x3 tap
    wcat_ref,     # (planes+width, Cin) bf16  [downsample conv ; conv1] (or (width, Cin))
    scat_ref,     # (planes+width, 1)   f32   folded-BN scales for wcat rows
    bcat_ref,     # (planes+width, 1)   f32   folded-BN biases for wcat rows
    w2_ref,       # (width, 9*width)    bf16  conv2 3x3 in im2col layout
    s2_ref, b2_ref,   # (width, 1)      f32
    w3_ref,       # (planes, width)     bf16  conv3 1x1
    s3_ref, b3_ref,   # (planes, 1)     f32
    wfc_ref,      # (planes, planes)    f32   SE fc weight (torch (out, in) layout)
    bfc_ref,      # (planes, 1)         f32
    o_ref,        # (1, planes, HW)     f32
    *, W, has_downsample,
):
    HW = x_ref.shape[2]
    planes = w3_ref.shape[0]

    x = x_ref[0]                                     # (Cin, HW) f32
    xb = x.astype(jnp.bfloat16)

    # ---- conv1 (1x1) fused with the downsample conv (1x1): one MXU launch ----
    hcat = jnp.dot(wcat_ref[...], xb, preferred_element_type=jnp.float32)
    hcat = hcat * scat_ref[...] + bcat_ref[...]      # folded-BN affine (f32)
    if has_downsample:
        idn = hcat[:planes, :]                       # bn_d(conv_d(x))     (planes, HW)
        h1 = jnp.maximum(hcat[planes:, :], 0.0)      # relu(bn1(conv1(x))) (width, HW)
    else:
        idn = x                                      # identity (Cin == planes)
        h1 = jnp.maximum(hcat, 0.0)

    # ---- conv2 (3x3, pad=1, stride=1) as a single im2col matmul -------------
    # Tap (ky, kx) needs h1 shifted by s = (ky-1)*W + (kx-1) along the flattened
    # HW lane axis; realized as a static slice of [h1 | h1] (lowers to lane
    # rotates on the XLU).  Wrap-around / row-edge leakage is removed by the
    # precomputed {0,1} masks.
    h1d = jnp.concatenate([h1, h1], axis=1)          # (width, 2*HW) f32
    taps = []
    for ky in range(3):
        for kx in range(3):
            start = ((ky - 1) * W + (kx - 1)) % HW
            shifted = h1d[:, start:start + HW] if start else h1
            taps.append(shifted * mask_ref[ky * 3 + kx])
    a2 = jnp.concatenate(taps, axis=0).astype(jnp.bfloat16)   # (9*width, HW)
    h2 = jnp.dot(w2_ref[...], a2, preferred_element_type=jnp.float32)
    h2 = jnp.maximum(h2 * s2_ref[...] + b2_ref[...], 0.0)     # (width, HW)

    # ---- conv3 (1x1) + bn3 (no relu yet) -------------------------------------
    h3 = jnp.dot(w3_ref[...], h2.astype(jnp.bfloat16),
                 preferred_element_type=jnp.float32)
    h3 = h3 * s3_ref[...] + b3_ref[...]              # (planes, HW)

    # ---- squeeze & excitation -------------------------------------------------
    # fc applied before the spatial mean (mathematically identical: both are
    # linear); keeps the MXU operand lane-dense instead of an N=1 matmul.
    # Kept in f32 -- it is tiny and its output gates everything multiplicatively.
    fc_full = jnp.dot(wfc_ref[...], h3, preferred_element_type=jnp.float32)
    se = jax.nn.sigmoid(jnp.mean(fc_full, axis=1, keepdims=True) + bfc_ref[...])

    # ---- scale, residual add, relu --------------------------------------------
    o_ref[0] = jnp.maximum(h3 * se + idn, 0.0)


# ------------------------------ wrapper --------------------------------------
def _conv3x3_border_masks(H, W):
    """{0,1} masks (9, 1, H*W): valid positions of each 3x3 tap after a lane shift."""
    y = jnp.arange(H * W, dtype=jnp.int32) // W
    x = jnp.arange(H * W, dtype=jnp.int32) % W
    rows = []
    for ky in range(3):
        for kx in range(3):
            dy, dx = ky - 1, kx - 1
            valid = ((y + dy >= 0) & (y + dy < H) & (x + dx >= 0) & (x + dx < W))
            rows.append(valid.astype(jnp.float32))
    return jnp.stack(rows, axis=0)[:, None, :]       # (9, 1, H*W)


def _full_block(a):
    zeros = (0,) * a.ndim
    return pl.BlockSpec(a.shape, lambda b, zeros=zeros: zeros)


def se_block_forward(x_nchw, kparams):
    """x_nchw: (B, Cin, H, W) float32. Returns (B, planes, H, W) float32."""
    B, Cin, H, W = x_nchw.shape
    HW = H * W
    planes = kparams["w3"].shape[0]
    has_ds = kparams["has_downsample"]
    if not has_ds:
        assert Cin == planes, "identity path requires inplanes == planes"

    x_flat = x_nchw.reshape(B, Cin, HW).astype(jnp.float32)
    masks = _conv3x3_border_masks(H, W)

    weights = [kparams[k] for k in
               ("wcat", "scat", "bcat", "w2", "s2", "b2",
                "w3", "s3", "b3", "wfc", "bfc")]
    in_specs = ([pl.BlockSpec((1, Cin, HW), lambda b: (b, 0, 0)),
                 _full_block(masks)]
                + [_full_block(w) for w in weights])

    kernel = functools.partial(_se_block_kernel, W=W, has_downsample=has_ds)
    out = pl.pallas_call(
        kernel,
        out_shape=jax.ShapeDtypeStruct((B, planes, HW), jnp.float32),
        grid_spec=pltpu.PrefetchScalarGridSpec(
            num_scalar_prefetch=0,
            grid=(B,),
            in_specs=in_specs,
            out_specs=pl.BlockSpec((1, planes, HW), lambda b: (b, 0, 0)),
        ),
        compiler_params=pltpu.CompilerParams(
            dimension_semantics=("parallel",)),
    )(x_flat, masks, *weights)
    return out.reshape(B, planes, H, W)


# ---------------------- parameter construction / prep -------------------------
def _fold_bn(bn, eps=1e-5):
    gamma, beta, mean, var = bn
    scale = gamma / jnp.sqrt(var + eps)
    return scale, beta - mean * scale


def prepare_kernel_params(raw):
    """Rearrange torch-layout params into the kernel's transposed/fused layout."""
    s1, b1 = _fold_bn(raw["bn1"])
    s2, b2 = _fold_bn(raw["bn2"])
    s3, b3 = _fold_bn(raw["bn3"])
    w1 = raw["conv1_w"]                                   # (width, Cin)
    width = w1.shape[0]
    if raw["has_downsample"]:
        sd, bd = _fold_bn(raw["ds_bn"])
        wcat = jnp.concatenate([raw["ds_w"], w1], axis=0)  # (planes+width, Cin)
        scat = jnp.concatenate([sd, s1])[:, None]
        bcat = jnp.concatenate([bd, b1])[:, None]
    else:
        wcat, scat, bcat = w1, s1[:, None], b1[:, None]
    # conv2 (co, ci, ky, kx) -> im2col (co, (ky*3+kx)*width + ci)
    w2col = jnp.transpose(raw["conv2_w"], (0, 2, 3, 1)).reshape(width, 9 * width)
    return dict(
        wcat=wcat.astype(jnp.bfloat16), scat=scat, bcat=bcat,
        w2=w2col.astype(jnp.bfloat16), s2=s2[:, None], b2=b2[:, None],
        w3=raw["conv3_w"].astype(jnp.bfloat16), s3=s3[:, None], b3=b3[:, None],
        wfc=raw["fc_w"], bfc=raw["fc_b"][:, None],
        has_downsample=raw["has_downsample"],
    )


def make_raw_params(key, inplanes, planes, base_width=64, groups=1):
    """Random torch-layout parameters for SeBlock(inplanes, planes), eval-mode BN."""
    width = int(planes / 4 * (base_width / 64.0)) * groups
    keys = iter(jax.random.split(key, 32))

    def bn_params(c):
        gamma = 1.0 + 0.1 * jax.random.normal(next(keys), (c,), jnp.float32)
        beta = 0.1 * jax.random.normal(next(keys), (c,), jnp.float32)
        mean = 0.1 * jax.random.normal(next(keys), (c,), jnp.float32)
        var = jax.random.uniform(next(keys), (c,), jnp.float32, minval=0.5, maxval=1.5)
        return gamma, beta, mean, var

    raw = {
        "conv1_w": 0.2 * jax.random.normal(next(keys), (width, inplanes), jnp.float32),
        "bn1": bn_params(width),
        "conv2_w": 0.2 * jax.random.normal(next(keys), (width, width, 3, 3), jnp.float32),
        "bn2": bn_params(width),
        "conv3_w": 0.2 * jax.random.normal(next(keys), (planes, width), jnp.float32),
        "bn3": bn_params(planes),
        "fc_w": 0.2 * jax.random.normal(next(keys), (planes, planes), jnp.float32),
        "fc_b": 0.1 * jax.random.normal(next(keys), (planes,), jnp.float32),
        "has_downsample": inplanes != planes,   # stride=1 assumed
    }
    if raw["has_downsample"]:
        raw["ds_w"] = 0.2 * jax.random.normal(next(keys), (planes, inplanes), jnp.float32)
        raw["ds_bn"] = bn_params(planes)
    return raw


# --------------------------- reference (pure JAX) -----------------------------
def se_block_reference(x, raw, eps=1e-5):
    """NCHW reference mirroring the kernel's bf16 matmul / f32 accumulate precision."""
    def bn(t, p):
        gamma, beta, mean, var = p
        s = (gamma / jnp.sqrt(var + eps))[None, :, None, None]
        return (t - mean[None, :, None, None]) * s + beta[None, :, None, None]

    def conv1x1(t, w):   # w: (Cout, Cin)
        return jnp.einsum("oc,bchw->bohw", w.astype(jnp.bfloat16),
                          t.astype(jnp.bfloat16),
                          preferred_element_type=jnp.float32)

    B, Cin, H, W = x.shape
    out = jax.nn.relu(bn(conv1x1(x, raw["conv1_w"]), raw["bn1"]))

    w2 = raw["conv2_w"]                              # (width, width, 3, 3)
    width = w2.shape[0]
    xp = jnp.pad(out, ((0, 0), (0, 0), (1, 1), (1, 1)))
    acc = jnp.zeros((B, width, H, W), jnp.float32)
    for ky in range(3):
        for kx in range(3):
            acc = acc + jnp.einsum("oc,bchw->bohw",
                                   w2[:, :, ky, kx].astype(jnp.bfloat16),
                                   xp[:, :, ky:ky + H, kx:kx + W].astype(jnp.bfloat16),
                                   preferred_element_type=jnp.float32)
    out = jax.nn.relu(bn(acc, raw["bn2"]))

    out = bn(conv1x1(out, raw["conv3_w"]), raw["bn3"])

    se = jnp.mean(out, axis=(2, 3))                               # (B, planes)
    se = jax.nn.sigmoid(se @ raw["fc_w"].T + raw["fc_b"])         # f32 fc, like kernel
    out = out * se[:, :, None, None]

    if raw["has_downsample"]:
        identity = bn(conv1x1(x, raw["ds_w"]), raw["ds_bn"])
    else:
        identity = x.astype(jnp.float32)
    return jax.nn.relu(out + identity)


# ----------------------------------- main -------------------------------------
if __name__ == "__main__":
    key = jax.random.PRNGKey(0)

    # Case 1: downsample present (inplanes != planes).
    B, inplanes, planes, H, W = 2, 8, 16, 16, 16
    kx_, kp_ = jax.random.split(key)
    x = jax.random.normal(kx_, (B, inplanes, H, W), jnp.float32)   # NCHW input
    raw = make_raw_params(kp_, inplanes, planes)
    kparams = prepare_kernel_params(raw)

    fwd = jax.jit(functools.partial(se_block_forward, kparams=kparams))
    out = jax.block_until_ready(fwd(x))
    ref = se_block_reference(x, raw)
    assert out.shape == (B, planes, H, W), out.shape
    assert jnp.allclose(out, ref, atol=5e-3, rtol=5e-3), float(
        jnp.max(jnp.abs(out - ref)))

    # Case 2: no downsample (inplanes == planes) -- identity path uses x directly,
    # the downsample matmul is skipped.
    inplanes2 = planes2 = 16
    kx2, kp2 = jax.random.split(kp_)
    x2 = jax.random.normal(kx2, (B, inplanes2, H, W), jnp.float32)
    raw2 = make_raw_params(kp2, inplanes2, planes2)
    kparams2 = prepare_kernel_params(raw2)

    fwd2 = jax.jit(functools.partial(se_block_forward, kparams=kparams2))
    out2 = jax.block_until_ready(fwd2(x2))
    ref2 = se_block_reference(x2, raw2)
    assert out2.shape == (B, planes2, H, W), out2.shape
    assert jnp.allclose(out2, ref2, atol=5e-3, rtol=5e-3), float(
        jnp.max(jnp.abs(out2 - ref2)))

    print("KERNEL_OK")
</pallas_src>

<mosaic_0001>
module attributes {stable_mosaic.version = 11 : i64} {
  func.func @_se_block_kernel(%arg0: i32, %arg1: memref<1x8x256xf32, #tpu.memory_space<vmem>>, %arg2: memref<9x1x256xf32, #tpu.memory_space<vmem>>, %arg3: memref<20x8xbf16, #tpu.memory_space<vmem>>, %arg4: memref<20x1xf32, #tpu.memory_space<vmem>>, %arg5: memref<20x1xf32, #tpu.memory_space<vmem>>, %arg6: memref<4x36xbf16, #tpu.memory_space<vmem>>, %arg7: memref<4x1xf32, #tpu.memory_space<vmem>>, %arg8: memref<4x1xf32, #tpu.memory_space<vmem>>, %arg9: memref<16x4xbf16, #tpu.memory_space<vmem>>, %arg10: memref<16x1xf32, #tpu.memory_space<vmem>>, %arg11: memref<16x1xf32, #tpu.memory_space<vmem>>, %arg12: memref<16x16xf32, #tpu.memory_space<vmem>>, %arg13: memref<16x1xf32, #tpu.memory_space<vmem>>, %arg14: memref<1x16x256xf32, #tpu.memory_space<vmem>>) attributes {dimension_semantics = [#tpu.dimension_semantics<parallel>], iteration_bounds = array<i64: 2>, scalar_prefetch = 0 : i64, scratch_operands = 0 : i64, tpu.core_type = #tpu.core_type<tc>, window_params = [{transform_indices = @transform_0, window_bounds = array<i64: 1, 8, 256>}, {pipeline_mode = #tpu.pipeline_mode<synchronous>, transform_indices = @transform_1, window_bounds = array<i64: 9, 1, 256>}, {pipeline_mode = #tpu.pipeline_mode<synchronous>, transform_indices = @transform_2, window_bounds = array<i64: 20, 8>}, {pipeline_mode = #tpu.pipeline_mode<synchronous>, transform_indices = @transform_3, window_bounds = array<i64: 20, 1>}, {pipeline_mode = #tpu.pipeline_mode<synchronous>, transform_indices = @transform_4, window_bounds = array<i64: 20, 1>}, {pipeline_mode = #tpu.pipeline_mode<synchronous>, transform_indices = @transform_5, window_bounds = array<i64: 4, 36>}, {pipeline_mode = #tpu.pipeline_mode<synchronous>, transform_indices = @transform_6, window_bounds = array<i64: 4, 1>}, {pipeline_mode = #tpu.pipeline_mode<synchronous>, transform_indices = @transform_7, window_bounds = array<i64: 4, 1>}, {pipeline_mode = #tpu.pipeline_mode<synchronous>, transform_indices = @transform_8, window_bounds = array<i64: 16, 4>}, {pipeline_mode = #tpu.pipeline_mode<synchronous>, transform_indices = @transform_9, window_bounds = array<i64: 16, 1>}, {pipeline_mode = #tpu.pipeline_mode<synchronous>, transform_indices = @transform_10, window_bounds = array<i64: 16, 1>}, {pipeline_mode = #tpu.pipeline_mode<synchronous>, transform_indices = @transform_11, window_bounds = array<i64: 16, 16>}, {pipeline_mode = #tpu.pipeline_mode<synchronous>, transform_indices = @transform_12, window_bounds = array<i64: 16, 1>}, {transform_indices = @transform_13, window_bounds = array<i64: 1, 16, 256>}]} {
    %c0 = arith.constant 0 : index
    %c0_0 = arith.constant 0 : index
    %c0_1 = arith.constant 0 : index
    %0 = vector.load %arg1[%c0, %c0_0, %c0_1] : memref<1x8x256xf32, #tpu.memory_space<vmem>>, vector<1x8x256xf32>
    %1 = vector.shape_cast %0 : vector<1x8x256xf32> to vector<8x256xf32>
    %2 = arith.truncf %1 : vector<8x256xf32> to vector<8x256xbf16>
    %c0_2 = arith.constant 0 : index
    %c0_3 = arith.constant 0 : index
    %3 = vector.load %arg3[%c0_2, %c0_3] : memref<20x8xbf16, #tpu.memory_space<vmem>>, vector<20x8xbf16>
    %cst = arith.constant dense<0.000000e+00> : vector<20x256xf32>
    %4 = tpu.matmul %3, %2, %cst {dimension_numbers = #tpu.dot_dimension_numbers<[1], [0], [0], [1], [0, 0, 1, 1], [], []>} : vector<20x8xbf16>, vector<8x256xbf16>, vector<20x256xf32> -> vector<20x256xf32>
    %c0_4 = arith.constant 0 : index
    %c0_5 = arith.constant 0 : index
    %5 = vector.load %arg4[%c0_4, %c0_5] : memref<20x1xf32, #tpu.memory_space<vmem>>, vector<20x1xf32>
    %6 = vector.broadcast %5 : vector<20x1xf32> to vector<20x256xf32>
    %7 = arith.mulf %4, %6 : vector<20x256xf32>
    %c0_6 = arith.constant 0 : index
    %c0_7 = arith.constant 0 : index
    %8 = vector.load %arg5[%c0_6, %c0_7] : memref<20x1xf32, #tpu.memory_space<vmem>>, vector<20x1xf32>
    %9 = vector.broadcast %8 : vector<20x1xf32> to vector<20x256xf32>
    %10 = arith.addf %7, %9 : vector<20x256xf32>
    %11 = vector.extract_strided_slice %10 {offsets = [0, 0], sizes = [16, 256], strides = [1, 1]} : vector<20x256xf32> to vector<16x256xf32>
    %12 = vector.extract_strided_slice %10 {offsets = [16, 0], sizes = [4, 256], strides = [1, 1]} : vector<20x256xf32> to vector<4x256xf32>
    %cst_8 = arith.constant 0.000000e+00 : f32
    %13 = vector.broadcast %cst_8 : f32 to vector<4x256xf32>
    %14 = arith.maximumf %12, %13 : vector<4x256xf32>
    %15 = tpu.concatenate %14, %14 in 1 : vector<4x256xf32>, vector<4x256xf32> -> vector<4x512xf32>
    %16 = vector.extract_strided_slice %15 {offsets = [0, 239], sizes = [4, 256], strides = [1, 1]} : vector<4x512xf32> to vector<4x256xf32>
    %c0_9 = arith.constant 0 : index
    %c0_10 = arith.constant 0 : index
    %c0_11 = arith.constant 0 : index
    %17 = vector.load %arg2[%c0_9, %c0_10, %c0_11] : memref<9x1x256xf32, #tpu.memory_space<vmem>>, vector<1x1x256xf32>
    %18 = vector.shape_cast %17 : vector<1x1x256xf32> to vector<1x256xf32>
    %19 = vector.broadcast %18 : vector<1x256xf32> to vector<4x256xf32>
    %20 = arith.mulf %16, %19 : vector<4x256xf32>
    %21 = vector.extract_strided_slice %15 {offsets = [0, 240], sizes = [4, 256], strides = [1, 1]} : vector<4x512xf32> to vector<4x256xf32>
    %c1 = arith.constant 1 : index
    %c0_12 = arith.constant 0 : index
    %c0_13 = arith.constant 0 : index
    %22 = vector.load %arg2[%c1, %c0_12, %c0_13] : memref<9x1x256xf32, #tpu.memory_space<vmem>>, vector<1x1x256xf32>
    %23 = vector.shape_cast %22 : vector<1x1x256xf32> to vector<1x256xf32>
    %24 = vector.broadcast %23 : vector<1x256xf32> to vector<4x256xf32>
    %25 = arith.mulf %21, %24 : vector<4x256xf32>
    %26 = vector.extract_strided_slice %15 {offsets = [0, 241], sizes = [4, 256], strides = [1, 1]} : vector<4x512xf32> to vector<4x256xf32>
    %c2 = arith.constant 2 : index
    %c0_14 = arith.constant 0 : index
    %c0_15 = arith.constant 0 : index
    %27 = vector.load %arg2[%c2, %c0_14, %c0_15] : memref<9x1x256xf32, #tpu.memory_space<vmem>>, vector<1x1x256xf32>
    %28 = vector.shape_cast %27 : vector<1x1x256xf32> to vector<1x256xf32>
    %29 = vector.broadcast %28 : vector<1x256xf32> to vector<4x256xf32>
    %30 = arith.mulf %26, %29 : vector<4x256xf32>
    %31 = vector.extract_strided_slice %15 {offsets = [0, 255], sizes = [4, 256], strides = [1, 1]} : vector<4x512xf32> to vector<4x256xf32>
    %c3 = arith.constant 3 : index
    %c0_16 = arith.constant 0 : index
    %c0_17 = arith.constant 0 : index
    %32 = vector.load %arg2[%c3, %c0_16, %c0_17] : memref<9x1x256xf32, #tpu.memory_space<vmem>>, vector<1x1x256xf32>
    %33 = vector.shape_cast %32 : vector<1x1x256xf32> to vector<1x256xf32>
    %34 = vector.broadcast %33 : vector<1x256xf32> to vector<4x256xf32>
    %35 = arith.mulf %31, %34 : vector<4x256xf32>
    %c4 = arith.constant 4 : index
    %c0_18 = arith.constant 0 : index
    %c0_19 = arith.constant 0 : index
    %36 = vector.load %arg2[%c4, %c0_18, %c0_19] : memref<9x1x256xf32, #tpu.memory_space<vmem>>, vector<1x1x256xf32>
    %37 = vector.shape_cast %36 : vector<1x1x256xf32> to vector<1x256xf32>
    %38 = vector.broadcast %37 : vector<1x256xf32> to vector<4x256xf32>
    %39 = arith.mulf %14, %38 : vector<4x256xf32>
    %40 = vector.extract_strided_slice %15 {offsets = [0, 1], sizes = [4, 256], strides = [1, 1]} : vector<4x512xf32> to vector<4x256xf32>
    %c5 = arith.constant 5 : index
    %c0_20 = arith.constant 0 : index
    %c0_21 = arith.constant 0 : index
    %41 = vector.load %arg2[%c5, %c0_20, %c0_21] : memref<9x1x256xf32, #tpu.memory_space<vmem>>, vector<1x1x256xf32>
    %42 = vector.shape_cast %41 : vector<1x1x256xf32> to vector<1x256xf32>
    %43 = vector.broadcast %42 : vector<1x256xf32> to vector<4x256xf32>
    %44 = arith.mulf %40, %43 : vector<4x256xf32>
    %45 = vector.extract_strided_slice %15 {offsets = [0, 15], sizes = [4, 256], strides = [1, 1]} : vector<4x512xf32> to vector<4x256xf32>
    %c6 = arith.constant 6 : index
    %c0_22 = arith.constant 0 : index
    %c0_23 = arith.constant 0 : index
    %46 = vector.load %arg2[%c6, %c0_22, %c0_23] : memref<9x1x256xf32, #tpu.memory_space<vmem>>, vector<1x1x256xf32>
    %47 = vector.shape_cast %46 : vector<1x1x256xf32> to vector<1x256xf32>
    %48 = vector.broadcast %47 : vector<1x256xf32> to vector<4x256xf32>
    %49 = arith.mulf %45, %48 : vector<4x256xf32>
    %50 = vector.extract_strided_slice %15 {offsets = [0, 16], sizes = [4, 256], strides = [1, 1]} : vector<4x512xf32> to vector<4x256xf32>
    %c7 = arith.constant 7 : index
    %c0_24 = arith.constant 0 : index
    %c0_25 = arith.constant 0 : index
    %51 = vector.load %arg2[%c7, %c0_24, %c0_25] : memref<9x1x256xf32, #tpu.memory_space<vmem>>, vector<1x1x256xf32>
    %52 = vector.shape_cast %51 : vector<1x1x256xf32> to vector<1x256xf32>
    %53 = vector.broadcast %52 : vector<1x256xf32> to vector<4x256xf32>
    %54 = arith.mulf %50, %53 : vector<4x256xf32>
    %55 = vector.extract_strided_slice %15 {offsets = [0, 17], sizes = [4, 256], strides = [1, 1]} : vector<4x512xf32> to vector<4x256xf32>
    %c8 = arith.constant 8 : index
    %c0_26 = arith.constant 0 : index
    %c0_27 = arith.constant 0 : index
    %56 = vector.load %arg2[%c8, %c0_26, %c0_27] : memref<9x1x256xf32, #tpu.memory_space<vmem>>, vector<1x1x256xf32>
    %57 = vector.shape_cast %56 : vector<1x1x256xf32> to vector<1x256xf32>
    %58 = vector.broadcast %57 : vector<1x256xf32> to vector<4x256xf32>
    %59 = arith.mulf %55, %58 : vector<4x256xf32>
    %60 = tpu.concatenate %20, %25, %30, %35, %39, %44, %49, %54, %59 in 0 : vector<4x256xf32>, vector<4x256xf32>, vector<4x256xf32>, vector<4x256xf32>, vector<4x256xf32>, vector<4x256xf32>, vector<4x256xf32>, vector<4x256xf32>, vector<4x256xf32> -> vector<36x256xf32>
    %61 = arith.truncf %60 : vector<36x256xf32> to vector<36x256xbf16>
    %c0_28 = arith.constant 0 : index
    %c0_29 = arith.constant 0 : index
    %62 = vector.load %arg6[%c0_28, %c0_29] : memref<4x36xbf16, #tpu.memory_space<vmem>>, vector<4x36xbf16>
    %cst_30 = arith.constant dense<0.000000e+00> : vector<4x256xf32>
    %63 = tpu.matmul %62, %61, %cst_30 {dimension_numbers = #tpu.dot_dimension_numbers<[1], [0], [0], [1], [0, 0, 1, 1], [], []>} : vector<4x36xbf16>, vector<36x256xbf16>, vector<4x256xf32> -> vector<4x256xf32>
    %c0_31 = arith.constant 0 : index
    %c0_32 = arith.constant 0 : index
    %64 = vector.load %arg7[%c0_31, %c0_32] : memref<4x1xf32, #tpu.memory_space<vmem>>, vector<4x1xf32>
    %65 = vector.broadcast %64 : vector<4x1xf32> to vector<4x256xf32>
    %66 = arith.mulf %63, %65 : vector<4x256xf32>
    %c0_33 = arith.constant 0 : index
    %c0_34 = arith.constant 0 : index
    %67 = vector.load %arg8[%c0_33, %c0_34] : memref<4x1xf32, #tpu.memory_space<vmem>>, vector<4x1xf32>
    %68 = vector.broadcast %67 : vector<4x1xf32> to vector<4x256xf32>
    %69 = arith.addf %66, %68 : vector<4x256xf32>
    %cst_35 = arith.constant 0.000000e+00 : f32
    %70 = vector.broadcast %cst_35 : f32 to vector<4x256xf32>
    %71 = arith.maximumf %69, %70 : vector<4x256xf32>
    %c0_36 = arith.constant 0 : index
    %c0_37 = arith.constant 0 : index
    %72 = vector.load %arg9[%c0_36, %c0_37] : memref<16x4xbf16, #tpu.memory_space<vmem>>, vector<16x4xbf16>
    %73 = arith.truncf %71 : vector<4x256xf32> to vector<4x256xbf16>
    %cst_38 = arith.constant dense<0.000000e+00> : vector<16x256xf32>
    %74 = tpu.matmul %72, %73, %cst_38 {dimension_numbers = #tpu.dot_dimension_numbers<[1], [0], [0], [1], [0, 0, 1, 1], [], []>} : vector<16x4xbf16>, vector<4x256xbf16>, vector<16x256xf32> -> vector<16x256xf32>
    %c0_39 = arith.constant 0 : index
    %c0_40 = arith.constant 0 : index
    %75 = vector.load %arg10[%c0_39, %c0_40] : memref<16x1xf32, #tpu.memory_space<vmem>>, vector<16x1xf32>
    %76 = vector.broadcast %75 : vector<16x1xf32> to vector<16x256xf32>
    %77 = arith.mulf %74, %76 : vector<16x256xf32>
    %c0_41 = arith.constant 0 : index
    %c0_42 = arith.constant 0 : index
    %78 = vector.load %arg11[%c0_41, %c0_42] : memref<16x1xf32, #tpu.memory_space<vmem>>, vector<16x1xf32>
    %79 = vector.broadcast %78 : vector<16x1xf32> to vector<16x256xf32>
    %80 = arith.addf %77, %79 : vector<16x256xf32>
    %c0_43 = arith.constant 0 : index
    %c0_44 = arith.constant 0 : index
    %81 = vector.load %arg12[%c0_43, %c0_44] : memref<16x16xf32, #tpu.memory_space<vmem>>, vector<16x16xf32>
    %cst_45 = arith.constant dense<0.000000e+00> : vector<16x256xf32>
    %82 = tpu.matmul %81, %80, %cst_45 {dimension_numbers = #tpu.dot_dimension_numbers<[1], [0], [0], [1], [0, 0, 1, 1], [], []>} : vector<16x16xf32>, vector<16x256xf32>, vector<16x256xf32> -> vector<16x256xf32>
    %cst_46 = arith.constant dense<0.000000e+00> : vector<16xf32>
    %83 = vector.multi_reduction <add>, %82, %cst_46 [1] : vector<16x256xf32> to vector<16xf32>
    %84 = vector.shape_cast %83 : vector<16xf32> to vector<16x1xf32>
    %cst_47 = arith.constant 2.560000e+02 : f32
    %85 = vector.broadcast %cst_47 : f32 to vector<16x1xf32>
    %86 = arith.divf %84, %85 : vector<16x1xf32>
    %c0_48 = arith.constant 0 : index
    %c0_49 = arith.constant 0 : index
    %87 = vector.load %arg13[%c0_48, %c0_49] : memref<16x1xf32, #tpu.memory_space<vmem>>, vector<16x1xf32>
    %88 = arith.addf %86, %87 : vector<16x1xf32>
    %89 = arith.negf %88 : vector<16x1xf32>
    %90 = math.exp %89 : vector<16x1xf32>
    %cst_50 = arith.constant 1.000000e+00 : f32
    %91 = vector.broadcast %cst_50 : f32 to vector<16x1xf32>
    %92 = arith.addf %91, %90 : vector<16x1xf32>
    %93 = arith.divf %91, %92 : vector<16x1xf32>
    %94 = vector.broadcast %93 : vector<16x1xf32> to vector<16x256xf32>
    %95 = arith.mulf %80, %94 : vector<16x256xf32>
    %96 = arith.addf %95, %11 : vector<16x256xf32>
    %cst_51 = arith.constant 0.000000e+00 : f32
    %97 = vector.broadcast %cst_51 : f32 to vector<16x256xf32>
    %98 = arith.maximumf %96, %97 : vector<16x256xf32>
    %c0_52 = arith.constant 0 : index
    %c0_53 = arith.constant 0 : index
    %c0_54 = arith.constant 0 : index
    %99 = vector.load %arg14[%c0_52, %c0_53, %c0_54] : memref<1x16x256xf32, #tpu.memory_space<vmem>>, vector<1x16x256xf32>
    %100 = vector.shape_cast %99 : vector<1x16x256xf32> to vector<16x256xf32>
    %101 = vector.shape_cast %98 : vector<16x256xf32> to vector<1x16x256xf32>
    tpu.vector_store %arg14[%c0_52, %c0_53, %c0_54], %101 {strides = array<i32>} : memref<1x16x256xf32, #tpu.memory_space<vmem>>, vector<1x16x256xf32>,
    return
  }
  func.func @transform_0(%arg0: i32) -> (i32, i32, i32) {
    %c0_i32 = arith.constant 0 : i32
    %c0_i32_0 = arith.constant 0 : i32
    %c0_i32_1 = arith.constant 0 : i32
    return %arg0, %c0_i32, %c0_i32_0 : i32, i32, i32
  }
  func.func @transform_1(%arg0: i32) -> (i32, i32, i32) {
    %c0_i32 = arith.constant 0 : i32
    %c0_i32_0 = arith.constant 0 : i32
    %c0_i32_1 = arith.constant 0 : i32
    %c0_i32_2 = arith.constant 0 : i32
    return %c0_i32, %c0_i32_0, %c0_i32_1 : i32, i32, i32
  }
  func.func @transform_2(%arg0: i32) -> (i32, i32) {
    %c0_i32 = arith.constant 0 : i32
    %c0_i32_0 = arith.constant 0 : i32
    %c0_i32_1 = arith.constant 0 : i32
    return %c0_i32, %c0_i32_0 : i32, i32
  }
  func.func @transform_3(%arg0: i32) -> (i32, i32) {
    %c0_i32 = arith.constant 0 : i32
    %c0_i32_0 = arith.constant 0 : i32
    %c0_i32_1 = arith.constant 0 : i32
    return %c0_i32, %c0_i32_0 : i32, i32
  }
  func.func @transform_4(%arg0: i32) -> (i32, i32) {
    %c0_i32 = arith.constant 0 : i32
    %c0_i32_0 = arith.constant 0 : i32
    %c0_i32_1 = arith.constant 0 : i32
    return %c0_i32, %c0_i32_0 : i32, i32
  }
  func.func @transform_5(%arg0: i32) -> (i32, i32) {
    %c0_i32 = arith.constant 0 : i32
    %c0_i32_0 = arith.constant 0 : i32
    %c0_i32_1 = arith.constant 0 : i32
    return %c0_i32, %c0_i32_0 : i32, i32
  }
  func.func @transform_6(%arg0: i32) -> (i32, i32) {
    %c0_i32 = arith.constant 0 : i32
    %c0_i32_0 = arith.constant 0 : i32
    %c0_i32_1 = arith.constant 0 : i32
    return %c0_i32, %c0_i32_0 : i32, i32
  }
  func.func @transform_7(%arg0: i32) -> (i32, i32) {
    %c0_i32 = arith.constant 0 : i32
    %c0_i32_0 = arith.constant 0 : i32
    %c0_i32_1 = arith.constant 0 : i32
    return %c0_i32, %c0_i32_0 : i32, i32
  }
  func.func @transform_8(%arg0: i32) -> (i32, i32) {
    %c0_i32 = arith.constant 0 : i32
    %c0_i32_0 = arith.constant 0 : i32
    %c0_i32_1 = arith.constant 0 : i32
    return %c0_i32, %c0_i32_0 : i32, i32
  }
  func.func @transform_9(%arg0: i32) -> (i32, i32) {
    %c0_i32 = arith.constant 0 : i32
    %c0_i32_0 = arith.constant 0 : i32
    %c0_i32_1 = arith.constant 0 : i32
    return %c0_i32, %c0_i32_0 : i32, i32
  }
  func.func @transform_10(%arg0: i32) -> (i32, i32) {
    %c0_i32 = arith.constant 0 : i32
    %c0_i32_0 = arith.constant 0 : i32
    %c0_i32_1 = arith.constant 0 : i32
    return %c0_i32, %c0_i32_0 : i32, i32
  }
  func.func @transform_11(%arg0: i32) -> (i32, i32) {
    %c0_i32 = arith.constant 0 : i32
    %c0_i32_0 = arith.constant 0 : i32
    %c0_i32_1 = arith.constant 0 : i32
    return %c0_i32, %c0_i32_0 : i32, i32
  }
  func.func @transform_12(%arg0: i32) -> (i32, i32) {
    %c0_i32 = arith.constant 0 : i32
    %c0_i32_0 = arith.constant 0 : i32
    %c0_i32_1 = arith.constant 0 : i32
    return %c0_i32, %c0_i32_0 : i32, i32
  }
  func.func @transform_13(%arg0: i32) -> (i32, i32, i32) {
    %c0_i32 = arith.constant 0 : i32
    %c0_i32_0 = arith.constant 0 : i32
    %c0_i32_1 = arith.constant 0 : i32
    return %arg0, %c0_i32, %c0_i32_0 : i32, i32, i32
  }
}

</mosaic_0001>

<bundles_post_ra>
// kernel: se_block_forward.1
= control target key start
LH: loop header
LB: loop body
LE: loop exit
PB: predicated region body
PF: predicated region fallthrough
CT: control target
= control target key end

     0   :  { %s1518_s25 = smov 0   ;;  %s1812_s0 = inlined_call_operand.vmem [shape: f32[2,8,256], index: 0, kind: input, shape index: {}]   ;;  %s1813_s1 = inlined_call_operand.vmem [shape: f32[9,1,256], index: 1, kind: input, shape index: {}]   ;;  %s1814_s2 = inlined_call_operand.vmem [shape: bf16[20,8], index: 2, kind: input, shape index: {}]   ;;  %s1815_s3 = inlined_call_operand.vmem [shape: f32[20,1], index: 3, kind: input, shape index: {}]   ;;  %s1816_s4 = inlined_call_operand.vmem [shape: f32[20,1], index: 4, kind: input, shape index: {}]   ;;  %s1817_s5 = inlined_call_operand.vmem [shape: bf16[4,36], index: 5, kind: input, shape index: {}]   ;;  %s1818_s6 = inlined_call_operand.vmem [shape: f32[4,1], index: 6, kind: input, shape index: {}]   ;;  %s1819_s7 = inlined_call_operand.vmem [shape: f32[4,1], index: 7, kind: input, shape index: {}]   ;;  %s1820_s8 = inlined_call_operand.vmem [shape: bf16[16,4], index: 8, kind: input, shape index: {}]   ;;  %s1821_s9 = inlined_call_operand.vmem [shape: f32[16,1], index: 9, kind: input, shape index: {}]   ;;  %s1822_s10 = inlined_call_operand.vmem [shape: f32[16,1], index: 10, kind: input, shape index: {}]   ;;  %s1823_s11 = inlined_call_operand.vmem [shape: f32[16,16], index: 11, kind: input, shape index: {}]   ;;  %s1824_s12 = inlined_call_operand.vmem [shape: f32[16,1], index: 12, kind: input, shape index: {}]   ;;  %s1825_s13 = inlined_call_operand.vmem [shape: f32[2,16,256], index: 13, kind: output, shape index: {}]  }
   0x1 LB: > { %s1310_s26 = sadd.s32 4294967295, %s1431_s25   ;;  %p1314_p0 = scmp.ge.s32.totalorder %s1431_s25, 1  ;;  %s1431_s25 = sphi %s1518_s25, %s23_s25  }
   0x2   : > { %p387_p1 = scmp.lt.s32.totalorder %s1431_s25, 3 }
   0x4   : > { %p388_p2 = pnand %p1314_p0, %p387_p1 }
   0x5   : > { %p431_p3 = scmp.lt.s32.totalorder (!%p388_p2), %s1310_s26, 1  ;;  %v574_v0 = vlaneseq (!%p388_p2)  ;;  %v1433_v1 = vmov (!%p388_p2), 0   ;;  %v524_v2 = vld [vmem:[%s1815_s3 + $0x10] sm:$0xf] (!%p388_p2)  ;;  %v1324_v5 = vld [vmem:[%s1813_s1 + $0x2] sm:$0x3] (!%p388_p2) }
   0x6   : > { %391 = sbr.rel (%p388_p2) target bundleno = 1509 (0x5e5), region = 72  ;;  %503 = vmatprep.mubr.bf16.mxu0 (!%p388_p2), %v1433_v1  ;;  %1372 = vset.pattern.permute.xlu0 (!%p388_p2), %v1433_v1  ;;  %v548_v4 = vld [vmem:[%s1816_s4 + $0x10] sm:$0xf] (!%p388_p2)  ;;  %v1326_v8 = vld [vmem:[%s1813_s1 + $0x6] sm:$0x3] (!%p388_p2)  ;;  %vm464_vm0 = vcmask (!%p388_p2), 1043456  }
   0x7   : > { %998 = vmatprep.mubr.bf16.mxu1 (!%p388_p2), %v1433_v1  ;;  %1413 = vset.pattern.permute.xlu1 (!%p388_p2), %v1433_v1  ;;  %v575_v3 = vshrl.u32 (!%p388_p2), %v574_v0, 7  ;;  %v1325_v15 = vld [vmem:[%s1813_s1 + $0x4] sm:$0x3] (!%p388_p2)  ;;  %s1434_s28 = smov (!%p388_p2), 112   ;;  %vm457_vm1 = vcmask (!%p388_p2), 64512   ;;  %s1436_s15 = smov (!%p388_p2), 113  }
   0x8   : > { %537 = vperm.xlu0 (!%p388_p2), %1372, %v524_v2   ;;  %v1414_v17 = vld [vmem:[%s1814_s2] sm:$0xff] (!%p388_p2)   ;;  %v1328_v20 = vld [vmem:[%s1813_s1 + $0xa] sm:$0x3] (!%p388_p2)  ;;  %v1330_v23 = vld [vmem:[%s1813_s1 + $0xe] sm:$0x3] (!%p388_p2)  ;;  %s1437_s20 = smov (!%p388_p2), 1  }
   0x9   : > { %v1541_v6 = vsub.s32 (!%p388_p2), 0, %v575_v3  ;;  %v1543_v7 = vsub.s32 (!%p388_p2), 1, %v575_v3  ;;  %v1415_v24 = vld [vmem:[%s1814_s2 + $0x8] ss:$0 sps:$4 sm:$0x33] (!%p388_p2)   ;;  %s1438_s23 = smov (!%p388_p2), 16  }
   0xa   : > { %v1329_v27 = vld [vmem:[%s1813_s1 + $0xc] sm:$0x3] (!%p388_p2)  ;;  %v1331_v30 = vld [vmem:[%s1813_s1 + $0x10] sm:$0x3] (!%p388_p2)  ;;  %s1439_s30 = smov (!%p388_p2), 15   ;;  %s1440_s16 = smov (!%p388_p2), 17  }
   0xb   : > { %v600_v13 = vrot.slane (!%p388_p2), %v1324_v5, %v1541_v6  ;;  %v646_v14 = vrot.slane (!%p388_p2), %v1326_v8, %v1541_v6  ;;  %v604_v18 = vrot.slane (!%p388_p2), %v1324_v5, %v1543_v7  ;;  %v623_v19 = vrot.slane (!%p388_p2), %v1325_v15, %v1541_v6  ;;  %v572_v33 = vld [vmem:[%s1813_s1] sm:$0x3] (!%p388_p2)  ;;  %s1441_s17 = smov (!%p388_p2), 111   ;;  %v1327_v59 = vld [vmem:[%s1813_s1 + $0x8] sm:$0x3] (!%p388_p2)  ;;  %s1443_s21 = smov (!%p388_p2), 126  }
   0xc   : > { %561 = vperm.xlu0 (!%p388_p2), %1372, %v548_v4   ;;  %v650_v21 = vrot.slane (!%p388_p2), %v1326_v8, %v1543_v7  ;;  %v684_v22 = vrot.slane (!%p388_p2), %v1328_v20, %v1541_v6  ;;  %v627_v25 = vrot.slane (!%p388_p2), %v1325_v15, %v1543_v7  ;;  %v730_v26 = vrot.slane (!%p388_p2), %v1330_v23, %v1541_v6  ;;  %s1444_s22 = smov (!%p388_p2), 110   ;;  %s1446_s24 = smov (!%p388_p2), 94  }
   0xd   : > { %s1827_s26 = smov (!%p431_p3, %s1310_s26), 1  ;;  %605 = vrot.lane.b32.xlu1 %v600_v13, %s1434_s28  ;;  %v688_v28 = vrot.slane %v1328_v20, %v1543_v7  ;;  %v707_v29 = vrot.slane %v1329_v27, %v1541_v6  ;;  %v734_v31 = vrot.slane %v1330_v23, %v1543_v7  ;;  %v753_v32 = vrot.slane %v1331_v30, %v1541_v6 }
   0xe   : > { %s1343_s29 = sshll.u32 %s1827_s26, 4  ;;  %v711_v34 = vrot.slane %v1329_v27, %v1543_v7  ;;  %v577_v35 = vrot.slane %v572_v33, %v1541_v6  ;;  %v757_v36 = vrot.slane %v1331_v30, %v1543_v7  ;;  %v581_v37 = vrot.slane %v572_v33, %v1543_v7  ;;  %s1344_s27 = sshll.u32 %s1827_s26, 5 }
   0xf   : > { %s435_s19 = scalar_lea.vmem %s1812_s0, %s1343_s29  ;;  %s1435_s29 = smov 127   ;;  %vm716_vm2 = vcmask 121856   ;;  %vm632_vm3 = vcmask 924672   ;;  %vm609_vm4 = vcmask 916480   ;;  %v669_v2 = vrot.slane %v1327_v59, %v1541_v6 }
  0x10   : > { %v443_v9 = vld [vmem:[%s435_s19 + $0x8] sm:$0xff]  ;;  %v442_v10 = vld [vmem:[%s435_s19] sm:$0xff]  ;;  %651 = vrot.lane.b32.xlu0 %v646_v14, %s1435_s29  ;;  %vm655_vm5 = vcmask 1039360   ;;  %v673_v5 = vrot.slane %v1327_v59, %v1543_v7  ;;  %vm693_vm6 = vcmask 7168   ;;  %vm739_vm7 = vcmask 130048  }
  0x11   : > { %v445_v11 = vpack.c.bf16 %v443_v9, %v443_v9  ;;  %v444_v12 = vpack.c.bf16 %v442_v10, %v442_v10  ;;  %607 = vrot.lane.b32.xlu1 %v604_v18, %s1434_s28  ;;  %vm762_vm8 = vcmask 138240   ;;  %vm586_vm9 = vcmask 908288  }
  0x12   : > { %vm796_vm10 = vcmask 1031168   ;;  %vm856_vm11 = vcmask 785408   ;;  %vm874_vm12 = vcmask 777216   ;;  %vm841_vm13 = vcmask 900096  }
  0x13   : > { %1321 = vmatprep.subr.msk.bf16.mxu0 %vm464_vm0, %v445_v11  ;;  %v466_v16 = vsel %vm464_vm0, %v444_v12, 0  ;;  %vm889_vm14 = vcmask 769024   ;;  %vm959_vm15 = vcmask 1041408  }
  0x14   : > { %472 = vmatpush1.bf16.msra.mxu0 %v466_v16  ;;  %628 = vrot.lane.b32.xlu0 %v623_v19, %s1436_s15 }
  0x15   : > { %653 = vrot.lane.b32.xlu1 %v650_v21, %s1435_s29 }
  0x17   : > { %1322 = vmatmul.mubr.msk.bf16.vlgmr.msra.gmra.mrb[0].mxu0 %vm457_vm1, %v1414_v17 }
  0x18   : > { %513 = vmatprep.mubr.bf16.mxu0 %v1433_v1  ;;  %689 = vrot.lane.b32.xlu0 %v684_v22, %s1437_s20 }
  0x19   : > { %630 = vrot.lane.b32.xlu1 %v627_v25, %s1436_s15  ;;  %s440_s15 = scalar_lea.vmem %s1825_s13, %s1344_s27 }
  0x1c   : > { %735 = vrot.lane.b32.xlu0 %v730_v26, %s1438_s23 }
  0x1d   : > { %691 = vrot.lane.b32.xlu1 %v688_v28, %s1437_s20  ;;  %s1442_s20 = smov 96  }
  0x1f   : > { %1323 = vmatmul.mubr.msk.bf16.gmra.mrb[4].mxu0 %vm457_vm1, %v1415_v24  ;;  %vm1034_vm1 = vcmask 31744  }
  0x20   : > { %1076 = vmatprep.mubr.bf16.mxu0 %v1433_v1  ;;  %712 = vrot.lane.b32.xlu0 %v707_v29, %s1439_s30 }
  0x21   : > { %737 = vrot.lane.b32.xlu1 %v734_v31, %s1438_s23  ;;  %s1445_s23 = smov 95  }
  0x24   : > { %758 = vrot.lane.b32.xlu0 %v753_v32, %s1440_s16 }
  0x25   : > { %714 = vrot.lane.b32.xlu1 %v711_v34, %s1439_s30 }
  0x28   : > { %582 = vrot.lane.b32.xlu0 %v577_v35, %s1441_s17 }
  0x29   : > { %760 = vrot.lane.b32.xlu1 %v757_v36, %s1440_s16 }
  0x2d   : > { %584 = vrot.lane.b32.xlu1 %v581_v37, %s1441_s17 }
  0x7f   : > { %v1600_v38 = vpop.permute.xlu1 %605 }
  0x83   : > { %v608_v40 = vpop.permute.xlu1 %607 }
  0x84   : > { %v610_v10 = vsel %vm609_vm4, %v1600_v38, %v608_v40 }
  0x87   : > { %v538_v39 = vpop.permute.xlu0 %537  ;;  %v1602_v42 = vpop.permute.xlu1 %653 }
  0x8b   : > { %v562_v41 = vpop.permute.xlu0 %561  ;;  %v631_v44 = vpop.permute.xlu1 %630 }
  0x8f   : > { %v1604_v43 = vpop.permute.xlu0 %651  ;;  %v1606_v46 = vpop.permute.xlu1 %691 }
  0x90   : > { %v656_v6 = vsel %vm655_vm5, %v1604_v43, %v1602_v42 }
  0x93   : > { %v629_v45 = vpop.permute.xlu0 %628  ;;  %v1616_v52 = vpop.permute.xlu1 %737 }
  0x94   : > { %v633_v8 = vsel %vm632_vm3, %v629_v45, %v631_v44 }
  0x97   : > { %v690_v48 = vpop.permute.xlu0 %689  ;;  %v715_v63 = vpop.permute.xlu1 %714 }
  0x98   : > { %v694_v15 = vsel %vm693_vm6, %v690_v48, %v1606_v46 }
  0x9b   : > { %v736_v53 = vpop.permute.xlu0 %735  ;;  %v761_v19 = vpop.permute.xlu1 %760 }
  0x9c   : > { %v740_v16 = vsel %vm739_vm7, %v736_v53, %v1616_v52 }
  0x9f   : > { %v713_v0 = vpop.permute.xlu0 %712 }
  0xa0   : > { %v717_v3 = vsel %vm716_vm2, %v713_v0, %v715_v63 }
  0xa3   : > { %v759_v20 = vpop.permute.xlu0 %758 }
  0xa4   : > { %v763_v25 = vsel %vm762_vm8, %v759_v20, %v761_v19 }
  0xea   : > { %v1608_v47 = vpop.f32.mrb[0].mxu0 }
  0xeb   : > { %v1610_v49 = vpop.f32.mrb[1].mxu0 }
  0xec   : > { %v1612_v50 = vpop.f32.mrb[2].mxu0 }
  0xed   : > { %v1614_v51 = vpop.f32.mrb[3].mxu0 }
  0xf2   : > { %v515_v54 = vpop.f32.mrb[4].mxu0 }
  0xf3   : > { %v544_v55 = vmul.f32 %v538_v39, %v515_v54  ;;  %v517_v56 = vpop.f32.mrb[5].mxu0 }
  0xf4   : > { %v545_v57 = vmul.f32 %v538_v39, %v517_v56  ;;  %v519_v58 = vpop.f32.mrb[6].mxu0 }
  0xf5   : > { %v568_v60 = vadd.f32 %v562_v41, %v544_v55  ;;  %v520_v61 = vpop.f32.mrb[7].mxu0 }
  0xf6   : > { %v569_v62 = vadd.f32 %v562_v41, %v545_v57 }
  0xf7   : > { %v1621_v1 = vmax.f32 %v568_v60, 0.0 }
  0xf8   : > { %v1624_v4 = vmax.f32 %v569_v62, 0.0  ;;  %v1671_v62 = vpop.permute.xlu0 %582 }
  0xf9   : > { %v723_v9 = vmul.f32 %v715_v63, %v1621_v1  ;;  %v638_v11 = vmul.f32 %v633_v8, %v1621_v1  ;;  %v721_v7 = vmul.f32 %v713_v0, %v1621_v1  ;;  %v676_v14 = vmul.f32 %v669_v2, %v1621_v1  ;;  %v585_v63 = vpop.permute.xlu1 %584 }
  0xfa   : > { %v639_v12 = vmul.f32 %v631_v44, %v1624_v4  ;;  %v722_v13 = vmul.f32 %v717_v3, %v1624_v4  ;;  %v677_v18 = vmul.f32 %v673_v5, %v1624_v4  ;;  %v637_v21 = vmul.f32 %v629_v45, %v1624_v4 }
  0xfb   : > { %854 = vrot.lane.b32.xlu0 %v723_v9, %s1442_s20  ;;  %v615_v23 = vmul.f32 %v610_v10, %v1621_v1  ;;  %v616_v24 = vmul.f32 %v608_v40, %v1624_v4  ;;  %v767_v26 = vmul.f32 %v759_v20, %v1621_v1  ;;  %v698_v28 = vmul.f32 %v690_v48, %v1621_v1 }
  0xfc   : > { %v1373_v17 = vpack.i.bf16 %v639_v12, %v638_v11  ;;  %v1383_v22 = vpack.i.bf16 %v722_v13, %v721_v7  ;;  %v1378_v27 = vpack.i.bf16 %v677_v18, %v676_v14  ;;  %v614_v29 = vmul.f32 %v1600_v38, %v1624_v4 }
  0xfd   : > { %v774_v30 = vrot.slane %v615_v23, 4  ;;  %v775_v31 = vrot.slane %v616_v24, 4  ;;  %v699_v32 = vmul.f32 %v694_v15, %v1624_v4  ;;  %v832_v33 = vrot.slane %v698_v28, 4 }
  0xfe   : > { %1374 = vrot.lane.b32.xlu1 %v1373_v17, %s1443_s21  ;;  %v661_v34 = vmul.f32 %v656_v6, %v1621_v1  ;;  %v662_v35 = vmul.f32 %v1602_v42, %v1624_v4  ;;  %v744_v36 = vmul.f32 %v736_v53, %v1621_v1  ;;  %v700_v37 = vmul.f32 %v1606_v46, %v1621_v1 }
  0xff   : > { %790 = vrot.lane.b32.xlu0 %v637_v21, %s1443_s21  ;;  %v1388_v39 = vpack.i.bf16 %v775_v31, %v774_v30  ;;  %v833_v40 = vrot.slane %v699_v32, 4  ;;  %v745_v41 = vmul.f32 %v740_v16, %v1624_v4  ;;  %v768_v48 = vmul.f32 %v763_v25, %v1624_v4 }
 0x100   : > { %v806_v38 = vrot.slane %v661_v34, 4  ;;  %v807_v44 = vrot.slane %v662_v35, 4  ;;  %v865_v45 = vrot.slane %v744_v36, 4  ;;  %v773_v55 = vrot.slane %v614_v29, 4 }
 0x101   : > { %v1398_v54 = vpack.i.bf16 %v833_v40, %v832_v33  ;;  %v866_v42 = vrot.slane %v745_v41, 4  ;;  %v660_v53 = vmul.f32 %v1604_v43, %v1624_v4  ;;  %v1408_v56 = vpack.i.bf16 %v768_v48, %v767_v26 }
 0x102   : > { %1384 = vrot.lane.b32.xlu1 %v1383_v22, %s1442_s20  ;;  %v1393_v46 = vpack.i.bf16 %v807_v44, %v806_v38  ;;  %v834_v57 = vrot.slane %v700_v37, 4  ;;  %v746_v60 = vmul.f32 %v1616_v52, %v1621_v1  ;;  %v769_v61 = vmul.f32 %v761_v19, %v1621_v1 }
 0x103   : > { %1379 = vrot.lane.b32.xlu0 %v1378_v27, %s1441_s17  ;;  %v1403_v58 = vpack.i.bf16 %v866_v42, %v865_v45  ;;  %v805_v59 = vrot.slane %v660_v53, 4  ;;  %v587_v13 = vsel %vm586_vm9, %v1671_v62, %v585_v63  ;;  %v593_v27 = vmul.f32 %v585_v63, %v1624_v4 }
 0x104   : > { %v867_v43 = vrot.slane %v746_v60, 4  ;;  %v592_v35 = vmul.f32 %v587_v13, %v1621_v1  ;;  %v1087_v13 = vld [vmem:[%s1821_s9] sm:$0xff] }
 0x106   : > { %776 = vrot.lane.b32.xlu1 %v773_v55, %s1435_s29 }
 0x107   : > { %839 = vrot.lane.b32.xlu0 %v834_v57, %s1444_s22 }
 0x10a   : > { %808 = vrot.lane.b32.xlu1 %v805_v59, %s1434_s28 }
 0x10b   : > { %1389 = vrot.lane.b32.xlu0 %v1388_v39, %s1435_s29 }
 0x10e   : > { %1399 = vrot.lane.b32.xlu1 %v1398_v54, %s1444_s22 }
 0x10f   : > { %1394 = vrot.lane.b32.xlu0 %v1393_v46, %s1434_s28 }
 0x112   : > { %1404 = vrot.lane.b32.xlu1 %v1403_v58, %s1445_s23 }
 0x113   : > { %872 = vrot.lane.b32.xlu0 %v867_v43, %s1445_s23  ;;  %v591_v43 = vmul.f32 %v1671_v62, %v1624_v4 }
 0x116   : > { %1409 = vrot.lane.b32.xlu1 %v1408_v56, %s1446_s24 }
 0x117   : > { %887 = vrot.lane.b32.xlu0 %v769_v61, %s1446_s24 }
 0x16d   : > { %v1673_v0 = vpop.permute.xlu0 %854 }
 0x170   : > { %v1375_v2 = vpop.permute.xlu1 %1374 }
 0x171   : > { %v791_v3 = vpop.permute.xlu0 %790  ;;  %v1377_v20 = vunpack.i.h.bf16 %v1375_v2  ;;  %v1376_v21 = vunpack.i.l.bf16 %v1375_v2 }
 0x173   : > { %v798_v39 = vsel %vm796_vm10, %v1376_v21, %v1377_v20  ;;  %v797_v57 = vsel %vm796_vm10, %v791_v3, %v1376_v21 }
 0x174   : > { %v1675_v52 = vpop.permute.xlu1 %1384 }
 0x175   : > { %v1677_v5 = vpop.permute.xlu0 %1379  ;;  %v1386_v14 = vunpack.i.l.bf16 %v1675_v52  ;;  %v1387_v28 = vunpack.i.h.bf16 %v1675_v52 }
 0x176   : > { %v1381_v16 = vunpack.i.l.bf16 %v1677_v5  ;;  %v1382_v36 = vunpack.i.h.bf16 %v1677_v5 }
 0x177   : > { %v857_v44 = vsel %vm856_vm11, %v1386_v14, %v1387_v28 }
 0x178   : > { %v777_v8 = vpop.permute.xlu1 %776  ;;  %v825_v53 = vsel %vm586_vm9, %v1381_v16, %v1382_v36 }
 0x179   : > { %v1679_v9 = vpop.permute.xlu0 %839 }
 0x17c   : > { %v809_v10 = vpop.permute.xlu1 %808 }
 0x17d   : > { %v1390_v11 = vpop.permute.xlu0 %1389 }
 0x17e   : > { %v1392_v23 = vunpack.i.h.bf16 %v1390_v11  ;;  %v1391_v24 = vunpack.i.l.bf16 %v1390_v11 }
 0x180   : > { %v1681_v12 = vpop.permute.xlu1 %1399  ;;  %v783_v40 = vsel %vm655_vm5, %v1391_v24, %v1392_v23  ;;  %v897_v38 = vsel %vm464_vm0, %v593_v27, %v1392_v23  ;;  %v782_v58 = vsel %vm655_vm5, %v777_v8, %v1391_v24  ;;  %v858_v8 = vsel %vm856_vm11, %v1387_v28, %v1673_v0 }
 0x181   : > { %v1395_v6 = vpop.permute.xlu0 %1394  ;;  %v1401_v7 = vunpack.i.l.bf16 %v1681_v12  ;;  %v1402_v29 = vunpack.i.h.bf16 %v1681_v12  ;;  %v896_v56 = vsel %vm464_vm0, %v592_v35, %v783_v40  ;;  %v895_v3 = vsel %vm464_vm0, %v591_v43, %v782_v58 }
 0x182   : > { %v1397_v17 = vunpack.i.h.bf16 %v1395_v6  ;;  %v1396_v18 = vunpack.i.l.bf16 %v1395_v6 }
 0x183   : > { %v901_v25 = vsel %vm464_vm0, %v1381_v16, %v1401_v7  ;;  %v842_v45 = vsel %vm841_vm13, %v1401_v7, %v1402_v29  ;;  %v843_v5 = vsel %vm841_vm13, %v1402_v29, %v1679_v9  ;;  %v1007_v7 = vld [vmem:[%s1818_s6] sm:$0xf]  ;;  %v1088_v16 = vld [vmem:[%s1821_s9 + $0x8] sm:$0xff] }
 0x184   : > { %v1405_v15 = vpop.permute.xlu1 %1404  ;;  %v815_v32 = vsel %vm609_vm4, %v1396_v18, %v1397_v17  ;;  %v900_v34 = vsel %vm464_vm0, %v1377_v20, %v1397_v17  ;;  %v814_v54 = vsel %vm609_vm4, %v809_v10, %v1396_v18  ;;  %v902_v60 = vsel %vm464_vm0, %v825_v53, %v842_v45  ;;  %v1104_v17 = vld [vmem:[%s1822_s10 + $0x8] sm:$0xff] }
 0x185   : > { %v1406_v19 = vunpack.i.l.bf16 %v1405_v15  ;;  %v1407_v22 = vunpack.i.h.bf16 %v1405_v15  ;;  %v909_v48 = vpack.c.bf16 %v900_v34, %v897_v38  ;;  %v899_v1 = vsel %vm464_vm0, %v798_v39, %v815_v32  ;;  %v873_v46 = vpop.permute.xlu0 %872  ;;  %v1015_v15 = vld [vmem:[%s1819_s7] sm:$0xf] }
 0x186   : > { %v908_v59 = vpack.c.bf16 %v899_v1, %v896_v56  ;;  %v898_v63 = vsel %vm464_vm0, %v797_v57, %v814_v54  ;;  %v903_v12 = vsel %vm464_vm0, %v1382_v36, %v843_v5  ;;  %v916_v34 = vld [vmem:[%s1817_s5] sm:$0x3]  ;;  %v1447_v56 = vmov 0.0  }
 0x187   : > { %v904_v26 = vsel %vm464_vm0, %v1386_v14, %v1406_v19  ;;  %v875_v37 = vsel %vm874_vm12, %v1406_v19, %v1407_v22  ;;  %v876_v2 = vsel %vm874_vm12, %v1407_v22, %v873_v46  ;;  %v907_v4 = vpack.c.bf16 %v898_v63, %v895_v3  ;;  %v1103_v14 = vld [vmem:[%s1822_s10] sm:$0xff] }
 0x188   : > { %v1410_v30 = vpop.permute.xlu1 %1409  ;;  %v910_v31 = vpack.c.bf16 %v904_v26, %v901_v25  ;;  %v905_v55 = vsel %vm464_vm0, %v857_v44, %v875_v37  ;;  %v906_v62 = vsel %vm464_vm0, %v858_v8, %v876_v2  ;;  %vm955_vm0 = vcmask 293888   ;;  %v1416_v46 = vld [vmem:[%s1820_s8] sm:$0xff]  }
 0x189   : > { %v1411_v33 = vunpack.i.l.bf16 %v1410_v30  ;;  %v1412_v42 = vunpack.i.h.bf16 %v1410_v30  ;;  %v911_v61 = vpack.c.bf16 %v905_v55, %v902_v60  ;;  %v888_v11 = vpop.permute.xlu0 %887  ;;  %v912_v6 = vpack.c.bf16 %v906_v62, %v903_v12 }
 0x18a   : > { %932 = vrot.lane.b32.xlu0 %v910_v31, %s1440_s16 }
 0x18b   : > { %v913_v41 = vpack.c.bf16 %v1411_v33, %v1411_v33  ;;  %v890_v52 = vsel %vm889_vm14, %v1411_v33, %v1412_v42  ;;  %v891_v9 = vsel %vm889_vm14, %v1412_v42, %v888_v11 }
 0x18c   : > { %v914_v10 = vpack.c.bf16 %v890_v52, %v890_v52  ;;  %v915_v0 = vpack.c.bf16 %v891_v9, %v891_v9  ;;  %v1120_v9 = vld [vmem:[%s1823_s11 + $0x8] sm:$0xff] }
 0x18d   : > { %938 = vrot.lane.b32.xlu1 %v913_v41, %s1440_s16 }
 0x18e   : > { %930 = vrot.lane.b32.xlu0 %v909_v48, %s1440_s16 }
 0x191   : > { %928 = vrot.lane.b32.xlu1 %v908_v59, %s1440_s16 }
 0x192   : > { %934 = vrot.lane.b32.xlu0 %v911_v61, %s1440_s16 }
 0x195   : > { %926 = vrot.lane.b32.xlu1 %v907_v4, %s1440_s16 }
 0x196   : > { %940 = vrot.lane.b32.xlu0 %v914_v10, %s1440_s16 }
 0x199   : > { %936 = vrot.lane.b32.xlu1 %v912_v6, %s1440_s16 }
 0x19a   : > { %1010 = vperm.xlu0 %1372, %v1007_v7   ;;  %v1119_v7 = vld [vmem:[%s1823_s11] sm:$0xff] }
 0x19d   : > { %942 = vrot.lane.b32.xlu1 %v915_v0, %s1440_s16 }
 0x19e   : > { %1091 = vperm.xlu0 %1372, %v1087_v13  }
 0x1a1   : > { %1018 = vperm.xlu1 %1413, %v1015_v15  }
 0x1a2   : > { %1107 = vperm.xlu0 %1372, %v1103_v14  }
 0x1a5   : > { %1096 = vperm.xlu1 %1413, %v1088_v16  }
 0x1a9   : > { %1112 = vperm.xlu1 %1413, %v1104_v17  }
 0x1fc   : > { %v933_v18 = vpop.permute.xlu0 %932 }
 0x1ff   : > { %v939_v19 = vpop.permute.xlu1 %938 }
 0x200   : > { %v931_v20 = vpop.permute.xlu0 %930 }
 0x203   : > { %v929_v21 = vpop.permute.xlu1 %928 }
 0x204   : > { %v946_v22 = vsel %vm762_vm8, %v929_v21, %v931_v20  ;;  %v935_v23 = vpop.permute.xlu0 %934  ;;  %v547_v20 = vld [vmem:[%s1816_s4 + $0x8] sm:$0xff] }
 0x205   : > { %966 = vmatprep.subr.bf16.mxu1 %v946_v22  ;;  %v947_v29 = vsel %vm762_vm8, %v933_v18, %v935_v23  ;;  %v523_v18 = vld [vmem:[%s1815_s3 + $0x8] sm:$0xff]  ;;  %v1213_v22 = vld [vmem:[%s1824_s12] sm:$0xff] }
 0x207   : > { %v927_v24 = vpop.permute.xlu1 %926 }
 0x208   : > { %v945_v25 = vsel %vm762_vm8, %v927_v24, %v929_v21  ;;  %v941_v26 = vpop.permute.xlu0 %940  ;;  %v546_v21 = vld [vmem:[%s1816_s4] sm:$0xff] }
 0x209   : > { %967 = vmatpush1.bf16.msra.mxu1 %v945_v25  ;;  %v949_v30 = vsel %vm762_vm8, %v939_v19, %v941_v26  ;;  %v522_v19 = vld [vmem:[%s1815_s3] sm:$0xff] }
 0x20a   : > { %v961_v33 = vsel %vm959_vm15, %v949_v30, 0 }
 0x20b   : > { %v937_v27 = vpop.permute.xlu1 %936 }
 0x20c   : > { %v948_v28 = vsel %vm762_vm8, %v935_v23, %v937_v27 }
 0x20d   : > { %968 = vmatprep.subr.bf16.mxu1 %v948_v28 }
 0x20e   : > { %969 = vmatpush1.bf16.msra.mxu1 %v947_v29 }
 0x20f   : > { %v943_v31 = vpop.permute.xlu1 %942 }
 0x210   : > { %v950_v32 = vsel %vm762_vm8, %v941_v26, %v943_v31  ;;  %v1214_v26 = vld [vmem:[%s1824_s12 + $0x8] sm:$0xff] }
 0x211   : > { %1332 = vmatprep.subr.msk.bf16.mxu1 %vm959_vm15, %v950_v32 }
 0x212   : > { %971 = vmatpush1.bf16.msra.mxu1 %v961_v33 }
 0x215   : > { %1333 = vmatmul.mubr.msk.bf16.vlgmr.msra.gmra.mrb[0].mxu1 %vm955_vm0, %v916_v34 }
 0x216   : > { %1191 = vmatprep.mubr.f32.mxu1 %v1447_v56 }
 0x219   : > { %v1011_v35 = vpop.permute.xlu0 %1010 }
 0x21d   : > { %v1092_v58 = vpop.permute.xlu0 %1091 }
 0x220   : > { %v1019_v40 = vpop.permute.xlu1 %1018 }
 0x221   : > { %v1108_v8 = vpop.permute.xlu0 %1107 }
 0x224   : > { %v1097_v57 = vpop.permute.xlu1 %1096 }
 0x228   : > { %v1113_v3 = vpop.permute.xlu1 %1112 }
 0x2e8   : > { %v1000_v36 = vpop.f32.mrb[0].mxu1 }
 0x2e9   : > { %v1013_v37 = vmul.f32 %v1011_v35, %v1000_v36  ;;  %v1002_v39 = vpop.f32.mrb[1].mxu1 }
 0x2ea   : > { %v1014_v41 = vmul.f32 %v1011_v35, %v1002_v39  ;;  %v1004_v38 = vpop.f32.mrb[2].mxu1 }
 0x2eb   : > { %v1021_v44 = vadd.f32 %v1019_v40, %v1013_v37  ;;  %v1005_v45 = vpop.f32.mrb[3].mxu1 }
 0x2ec   : > { %v1022_v48 = vadd.f32 %v1019_v40, %v1014_v41 }
 0x2ed   : > { %v1023_v1 = vmax.f32 %v1021_v44, 0.0 }
 0x2ee   : > { %v1024_v54 = vmax.f32 %v1022_v48, 0.0 }
 0x2ef   : > { %v1027_v42 = vpack.c.bf16 %v1023_v1, %v1023_v1 }
 0x2f0   : > { %v1028_v55 = vpack.c.bf16 %v1024_v54, %v1024_v54 }
 0x2f1   : > { %v1039_v53 = vsel %vm959_vm15, %v1027_v42, 0 }
 0x2f2   : > { %1335 = vmatprep.subr.msk.bf16.mxu0 %vm959_vm15, %v1028_v55 }
 0x2f3   : > { %1045 = vmatpush1.bf16.msra.mxu0 %v1039_v53 }
 0x2f6   : > { %1336 = vmatmul.mubr.msk.bf16.vlgmr.msra.gmra.mrb[8].mxu0 %vm1034_vm1, %v1416_v46 }
 0x3c9   : > { %v1078_v59 = vpop.f32.mrb[8].mxu0 }
 0x3ca   : > { %v1080_v60 = vpop.f32.mrb[9].mxu0  ;;  %v1099_v63 = vmul.f32 %v1092_v58, %v1078_v59 }
 0x3cb   : > { %v1100_v43 = vmul.f32 %v1092_v58, %v1080_v60  ;;  %v1082_v61 = vpop.f32.mrb[10].mxu0 }
 0x3cc   : > { %v1101_v2 = vmul.f32 %v1097_v57, %v1082_v61  ;;  %v1084_v52 = vpop.f32.mrb[11].mxu0  ;;  %v1115_v11 = vadd.f32 %v1108_v8, %v1099_v63 }
 0x3cd   : > { %v1102_v5 = vmul.f32 %v1097_v57, %v1084_v52  ;;  %v1116_v62 = vadd.f32 %v1108_v8, %v1100_v43 }
 0x3ce   : > { %v1767_v4 = vadd.f32 %v1113_v3, %v1101_v2 }
 0x3cf   : > { %v1769_v10 = vadd.f32 %v1113_v3, %v1102_v5 }
 0x3d0   : > { %v1347_v6 = vpack.c.bf16 %v1767_v4, %v1115_v11 }
 0x3d1   : > { %v1345_v12 = vpack.c.bf16 %v1769_v10, %v1116_v62 }
 0x3d3   : > { %1346 = vmatprep.subr.bf16.mxu1 %v1345_v12 }
 0x3d4   : > { %1348 = vmatpush1.bf16.msra.mxu1 %v1347_v6 }
 0x3d7   : > { %1337 = vmatmul.mubr.msk.f32.vlgmr.msra.gmra.mrb[4].mxu1 %vm739_vm7, %v1119_v7 }
 0x3d8   : > { %1197 = vmatprep.mubr.f32.mxu1 %v1447_v56 }
 0x3db   : > { %1338 = vmatmul.mubr.msk.f32.gmra.mrb[6].mxu1 %vm739_vm7, %v1120_v9 }
 0x4aa   : > { %v1193_v0 = vpop.f32.mrb[4].mxu1 }
 0x4ab   : > { %v1195_v13 = vpop.f32.mrb[5].mxu1 }
 0x4ac   : > { %v1204_v14 = vadd.f32 %v1195_v13, %v1193_v0 }
 0x4ae   : > { %1205 = vadd.xlane.f32.xlu0 %v1204_v14  ;;  %v1199_v15 = vpop.f32.mrb[6].mxu1 }
 0x4af   : > { %v1201_v16 = vpop.f32.mrb[7].mxu1 }
 0x4b0   : > { %v1207_v17 = vadd.f32 %v1201_v16, %v1199_v15 }
 0x4b2   : > { %1208 = vadd.xlane.f32.xlu1 %v1207_v17 }
 0x4c3   : > { %532 = vperm.xlu1 %1413, %v523_v18  }
 0x4c4   : > { %527 = vperm.xlu0 %1372, %v522_v19  }
 0x4c7   : > { %556 = vperm.xlu1 %1413, %v547_v20  }
 0x4c8   : > { %551 = vperm.xlu0 %1372, %v546_v21  }
 0x53b   : > { %v1206_v23 = vpop.xlane.xlu0 %1205 }
 0x53c   : > { %v1211_v24 = vmul.f32 0.00390625, %v1206_v23 }
 0x53e   : > { %v1215_v25 = vadd.f32 %v1213_v22, %v1211_v24 }
 0x53f   : > { %v1209_v27 = vpop.xlane.xlu1 %1208 }
 0x540   : > { %v1339_v28 = vmul.f32 -1.442695, %v1215_v25  ;;  %v1212_v29 = vmul.f32 0.00390625, %v1209_v27 }
 0x542   : > { %1417 = vpow2.f32 %v1339_v28  ;;  %v1216_v30 = vadd.f32 %v1214_v26, %v1212_v29 }
 0x543   : > { %v528_v39 = vpop.permute.xlu0 %527  ;;  %v533_v40 = vpop.permute.xlu1 %532 }
 0x544   : > { %v1340_v31 = vmul.f32 -1.442695, %v1216_v30  ;;  %v540_v38 = vmul.f32 %v528_v39, %v1608_v47  ;;  %v541_v44 = vmul.f32 %v528_v39, %v1610_v49  ;;  %v542_v53 = vmul.f32 %v533_v40, %v1612_v50 }
 0x545   : > { %v543_v46 = vmul.f32 %v533_v40, %v1614_v51 }
 0x546   : > { %1419 = vpow2.f32 %v1340_v31 }
 0x547   : > { %v552_v41 = vpop.permute.xlu0 %551  ;;  %v557_v45 = vpop.permute.xlu1 %556 }
 0x548   : > { %v564_v1 = vadd.f32 %v552_v41, %v540_v38  ;;  %v565_v54 = vadd.f32 %v552_v41, %v541_v44  ;;  %v566_v47 = vadd.f32 %v557_v45, %v542_v53  ;;  %v567_v58 = vadd.f32 %v557_v45, %v543_v46 }
 0x54c   : > { %v1418_v32 = vpop.eup %1417 }
 0x54d   : > { %v1223_v33 = vadd.f32 1.0, %v1418_v32 }
 0x54f   : > { %1421 = vrcp.f32 %v1223_v33 }
 0x550   : > { %v1420_v34 = vpop.eup %1419 }
 0x551   : > { %v1224_v35 = vadd.f32 1.0, %v1420_v34 }
 0x553   : > { %1423 = vrcp.f32 %v1224_v35 }
 0x559   : > { %v1422_v36 = vpop.eup %1421 }
 0x55a   : > { %1231 = vperm.xlu0 %1372, %v1422_v36  }
 0x55d   : > { %v1424_v37 = vpop.eup %1423 }
 0x55e   : > { %1236 = vperm.xlu1 %1413, %v1424_v37  }
 0x5d9   : > { %v1232_v48 = vpop.permute.xlu0 %1231 }
 0x5da   : > { %v1239_v42 = vmul.f32 %v1232_v48, %v1115_v11  ;;  %v1240_v55 = vmul.f32 %v1232_v48, %v1116_v62 }
 0x5dc   : > { %v1243_v56 = vadd.f32 %v1239_v42, %v564_v1  ;;  %v1244_v57 = vadd.f32 %v1240_v55, %v565_v54 }
 0x5dd   : > { %v1237_v49 = vpop.permute.xlu1 %1236 }
 0x5de   : > { %v1247_v59 = vmax.f32 %v1243_v56, 0.0  ;;  %v1248_v60 = vmax.f32 %v1244_v57, 0.0  ;;  %v1241_v43 = vmul.f32 %v1237_v49, %v1767_v4  ;;  %v1242_v61 = vmul.f32 %v1237_v49, %v1769_v10 }
 0x5e0   : > { %1251 = vst [vmem:[%s440_s15] sm:$0xff] %v1247_v59  ;;  %1252 = vst [vmem:[%s440_s15 + $0x8] sm:$0xff] %v1248_v60  ;;  %v1245_v50 = vadd.f32 %v1241_v43, %v566_v47  ;;  %v1246_v63 = vadd.f32 %v1242_v61, %v567_v58 }
 0x5e2   : > { %v1249_v51 = vmax.f32 %v1245_v50, 0.0  ;;  %v1250_v2 = vmax.f32 %v1246_v63, 0.0 }
 0x5e4   : > { %1253 = vst [vmem:[%s440_s15 + $0x10] sm:$0xff] %v1249_v51  ;;  %1254 = vst [vmem:[%s440_s15 + $0x18] sm:$0xff] %v1250_v2 }
 0x5e5 PF: > { %s23_s25 = sadd.s32 1, %s1431_s25  }
 0x5e6   : > { %p20_p4 = scmp.ge.s32.totalorder %s23_s25, 4  }
 0x5e8   :  { %22 = sbr.rel (!%p20_p4) target bundleno = 1 (0x1), region = 110 }

</bundles_post_ra>
